<compile_context>
chip_gen: v6e
topology: v6e:2x2x1
jax: 0.10.0
libtpu: 0.0.40
codegen_flags: <defaults>
</compile_context>

<pallas_src>
import functools

import jax
import jax.numpy as jnp
from jax.experimental import pallas as pl
from jax.experimental.pallas import tpu as pltpu

LOG_STD_MAX = 2.0
LOG_STD_MIN = -5.0

HIDDEN = 256


def _round_up(x, m):
    return (x + m - 1) // m * m


def actor_kernel(x_ref, w1_ref, b1_ref, w2_ref, b2_ref, wh_ref, bh_ref,
                 out_ref, *, act_pad):
    """fc1+relu -> fc2+relu -> fused (mean|logstd) head, all VMEM-resident."""
    x = x_ref[...].astype(jnp.bfloat16)

    h1 = jnp.dot(x, w1_ref[...], preferred_element_type=jnp.float32) + b1_ref[...]
    h1 = jnp.maximum(h1, 0.0)

    h2 = jnp.dot(h1.astype(jnp.bfloat16), w2_ref[...],
                 preferred_element_type=jnp.float32) + b2_ref[...]
    h2 = jnp.maximum(h2, 0.0)

    heads = jnp.dot(h2.astype(jnp.bfloat16), wh_ref[...],
                    preferred_element_type=jnp.float32) + bh_ref[...]

    mean = heads[:, :act_pad]
    log_std = jnp.tanh(heads[:, act_pad:])
    log_std = LOG_STD_MIN + 0.5 * (LOG_STD_MAX - LOG_STD_MIN) * (log_std + 1.0)

    out_ref[:, :act_pad] = mean
    out_ref[:, act_pad:] = log_std


def prepare_actor_params(params, n_obs, n_act):
    """One-time packing: zero-pad to TPU tiles, fuse the two heads, cast weights to bf16.

    Call once (outside the rollout loop) and reuse the result for every actor_forward call.
    """
    obs_pad = _round_up(n_obs, 128)
    act_pad = _round_up(max(n_act, 1), 128)

    w1 = jnp.zeros((obs_pad, HIDDEN), jnp.float32).at[:n_obs, :].set(params["w1"])
    w_head = (jnp.zeros((HIDDEN, 2 * act_pad), jnp.float32)
              .at[:, :n_act].set(params["w_mean"])
              .at[:, act_pad:act_pad + n_act].set(params["w_logstd"]))
    b_head = (jnp.zeros((1, 2 * act_pad), jnp.float32)
              .at[0, :n_act].set(params["b_mean"])
              .at[0, act_pad:act_pad + n_act].set(params["b_logstd"]))

    return {
        "w1": w1.astype(jnp.bfloat16),
        "b1": params["b1"].reshape(1, HIDDEN).astype(jnp.float32),
        "w2": params["w2"].astype(jnp.bfloat16),
        "b2": params["b2"].reshape(1, HIDDEN).astype(jnp.float32),
        "w_head": w_head.astype(jnp.bfloat16),
        "b_head": b_head,
    }


@functools.partial(jax.jit, static_argnames=("n_act",))
def actor_forward(x, packed, *, n_act):
    """x: [B, ...] (flattened like torch's x.view(B, -1)). Returns (mean, log_std) [B, n_act]."""
    x = x.reshape(x.shape[0], -1).astype(jnp.float32)
    B, n_obs = x.shape
    obs_pad = packed["w1"].shape[0]
    act_pad = packed["w_head"].shape[1] // 2

    # Batch tiling: <=512 rows per tile keeps double-buffered x/out tiles + weights
    # well inside v7x's tighter VMEM budget while still feeding the MXU.
    tile_b = min(_round_up(max(B, 8), 8), 512)
    b_pad = _round_up(max(B, tile_b), tile_b)

    if (b_pad, obs_pad) != (B, n_obs):
        x = jnp.pad(x, ((0, b_pad - B), (0, obs_pad - n_obs)))

    kernel = functools.partial(actor_kernel, act_pad=act_pad)
    full = lambda shape: pl.BlockSpec(shape, lambda i: (0, 0))

    cost = pl.CostEstimate(
        flops=2 * b_pad * (obs_pad * HIDDEN + HIDDEN * HIDDEN + HIDDEN * 2 * act_pad),
        transcendentals=b_pad * act_pad,
        bytes_accessed=(b_pad * obs_pad * 4                       # x
                        + packed["w1"].size * 2 + packed["w2"].size * 2
                        + packed["w_head"].size * 2               # bf16 weights
                        + (packed["b1"].size + packed["b2"].size
                           + packed["b_head"].size) * 4           # f32 biases
                        + b_pad * 2 * act_pad * 4),               # fused output
    )

    out = pl.pallas_call(
        kernel,
        out_shape=jax.ShapeDtypeStruct((b_pad, 2 * act_pad), jnp.float32),
        grid=(b_pad // tile_b,),
        in_specs=[
            pl.BlockSpec((tile_b, obs_pad), lambda i: (i, 0)),    # x tile (pipelined)
            full((obs_pad, HIDDEN)),                              # weights: constant block
            full((1, HIDDEN)),                                    # -> VMEM-resident
            full((HIDDEN, HIDDEN)),
            full((1, HIDDEN)),
            full((HIDDEN, 2 * act_pad)),
            full((1, 2 * act_pad)),
        ],
        out_specs=pl.BlockSpec((tile_b, 2 * act_pad), lambda i: (i, 0)),
        compiler_params=pltpu.CompilerParams(dimension_semantics=("parallel",)),
        cost_estimate=cost,
    )(x, packed["w1"], packed["b1"], packed["w2"], packed["b2"],
      packed["w_head"], packed["b_head"])

    mean = out[:B, :n_act]
    log_std = out[:B, act_pad:act_pad + n_act]
    return mean, log_std


def init_actor_params(key, n_obs, n_act):
    """Deterministic init mimicking torch.nn.Linear (U(-1/sqrt(fan_in), 1/sqrt(fan_in)))."""
    ks = jax.random.split(key, 8)

    def linear(kw, kb, fan_in, fan_out):
        bound = 1.0 / jnp.sqrt(fan_in)
        w = jax.random.uniform(kw, (fan_in, fan_out), jnp.float32, -bound, bound)
        b = jax.random.uniform(kb, (fan_out,), jnp.float32, -bound, bound)
        return w, b

    w1, b1 = linear(ks[0], ks[1], n_obs, HIDDEN)
    w2, b2 = linear(ks[2], ks[3], HIDDEN, HIDDEN)
    wm, bm = linear(ks[4], ks[5], HIDDEN, n_act)
    ws, bs = linear(ks[6], ks[7], HIDDEN, n_act)
    return {"w1": w1, "b1": b1, "w2": w2, "b2": b2,
            "w_mean": wm, "b_mean": bm, "w_logstd": ws, "b_logstd": bs}


def actor_forward_ref(x, params):
    """Pure-JAX f32 reference of the PyTorch forward."""
    x = x.reshape(x.shape[0], -1)
    h1 = jnp.maximum(x @ params["w1"] + params["b1"], 0.0)
    h2 = jnp.maximum(h1 @ params["w2"] + params["b2"], 0.0)
    mean = h2 @ params["w_mean"] + params["b_mean"]
    log_std = jnp.tanh(h2 @ params["w_logstd"] + params["b_logstd"])
    log_std = LOG_STD_MIN + 0.5 * (LOG_STD_MAX - LOG_STD_MIN) * (log_std + 1.0)
    return mean, log_std


# TODO(synk): get_action's reparameterized sampling / tanh-squash log_prob (and the
# action_scale/action_bias buffers it uses) is stochastic glue around the forward pass;
# only the deterministic forward() hot path is implemented as a kernel.

if __name__ == "__main__":
    key = jax.random.PRNGKey(0)
    n_obs, n_act, batch = 64, 2, 8   # small shapes consistent with the MLP actor

    k_params, k_x = jax.random.split(key)
    params = init_actor_params(k_params, n_obs, n_act)
    packed = prepare_actor_params(params, n_obs, n_act)   # one-time packing
    x = jax.random.normal(k_x, (batch, n_obs), jnp.float32)

    mean, log_std = actor_forward(x, packed, n_act=n_act)
    jax.block_until_ready((mean, log_std))

    mean_ref, logstd_ref = actor_forward_ref(x, params)
    assert mean.shape == (batch, n_act) and log_std.shape == (batch, n_act)
    # bf16 MXU operands (f32 accumulate) -> loosened tolerance vs f32 reference.
    assert jnp.allclose(mean, mean_ref, atol=5e-2, rtol=5e-2)
    assert jnp.allclose(log_std, logstd_ref, atol=5e-2, rtol=5e-2)

    print("KERNEL_OK")
</pallas_src>

<mosaic_0001>
module attributes {stable_mosaic.version = 11 : i64} {
  func.func @actor_kernel(%arg0: i32, %arg1: memref<8x128xf32, #tpu.memory_space<vmem>>, %arg2: memref<128x256xbf16, #tpu.memory_space<vmem>>, %arg3: memref<1x256xf32, #tpu.memory_space<vmem>>, %arg4: memref<256x256xbf16, #tpu.memory_space<vmem>>, %arg5: memref<1x256xf32, #tpu.memory_space<vmem>>, %arg6: memref<256x256xbf16, #tpu.memory_space<vmem>>, %arg7: memref<1x256xf32, #tpu.memory_space<vmem>>, %arg8: memref<8x256xf32, #tpu.memory_space<vmem>>) attributes {dimension_semantics = [#tpu.dimension_semantics<parallel>], iteration_bounds = array<i64: 1>, scalar_prefetch = 0 : i64, scratch_operands = 0 : i64, tpu.core_type = #tpu.core_type<tc>, window_params = [{transform_indices = @transform_0, window_bounds = array<i64: 8, 128>}, {pipeline_mode = #tpu.pipeline_mode<synchronous>, transform_indices = @transform_1, window_bounds = array<i64: 128, 256>}, {pipeline_mode = #tpu.pipeline_mode<synchronous>, transform_indices = @transform_2, window_bounds = array<i64: 1, 256>}, {pipeline_mode = #tpu.pipeline_mode<synchronous>, transform_indices = @transform_3, window_bounds = array<i64: 256, 256>}, {pipeline_mode = #tpu.pipeline_mode<synchronous>, transform_indices = @transform_4, window_bounds = array<i64: 1, 256>}, {pipeline_mode = #tpu.pipeline_mode<synchronous>, transform_indices = @transform_5, window_bounds = array<i64: 256, 256>}, {pipeline_mode = #tpu.pipeline_mode<synchronous>, transform_indices = @transform_6, window_bounds = array<i64: 1, 256>}, {transform_indices = @transform_7, window_bounds = array<i64: 8, 256>}]} {
    %c0 = arith.constant 0 : index
    %c0_0 = arith.constant 0 : index
    %0 = vector.load %arg1[%c0, %c0_0] : memref<8x128xf32, #tpu.memory_space<vmem>>, vector<8x128xf32>
    %1 = arith.truncf %0 : vector<8x128xf32> to vector<8x128xbf16>
    %c0_1 = arith.constant 0 : index
    %c0_2 = arith.constant 0 : index
    %2 = vector.load %arg2[%c0_1, %c0_2] : memref<128x256xbf16, #tpu.memory_space<vmem>>, vector<128x256xbf16>
    %cst = arith.constant dense<0.000000e+00> : vector<8x256xf32>
    %3 = tpu.matmul %1, %2, %cst {dimension_numbers = #tpu.dot_dimension_numbers<[1], [0], [0], [1], [0, 0, 1, 1], [], []>} : vector<8x128xbf16>, vector<128x256xbf16>, vector<8x256xf32> -> vector<8x256xf32>
    %c0_3 = arith.constant 0 : index
    %c0_4 = arith.constant 0 : index
    %4 = vector.load %arg3[%c0_3, %c0_4] : memref<1x256xf32, #tpu.memory_space<vmem>>, vector<1x256xf32>
    %5 = vector.broadcast %4 : vector<1x256xf32> to vector<8x256xf32>
    %6 = arith.addf %3, %5 : vector<8x256xf32>
    %cst_5 = arith.constant 0.000000e+00 : f32
    %7 = vector.broadcast %cst_5 : f32 to vector<8x256xf32>
    %8 = arith.maximumf %6, %7 : vector<8x256xf32>
    %9 = arith.truncf %8 : vector<8x256xf32> to vector<8x256xbf16>
    %c0_6 = arith.constant 0 : index
    %c0_7 = arith.constant 0 : index
    %10 = vector.load %arg4[%c0_6, %c0_7] : memref<256x256xbf16, #tpu.memory_space<vmem>>, vector<256x256xbf16>
    %cst_8 = arith.constant dense<0.000000e+00> : vector<8x256xf32>
    %11 = tpu.matmul %9, %10, %cst_8 {dimension_numbers = #tpu.dot_dimension_numbers<[1], [0], [0], [1], [0, 0, 1, 1], [], []>} : vector<8x256xbf16>, vector<256x256xbf16>, vector<8x256xf32> -> vector<8x256xf32>
    %c0_9 = arith.constant 0 : index
    %c0_10 = arith.constant 0 : index
    %12 = vector.load %arg5[%c0_9, %c0_10] : memref<1x256xf32, #tpu.memory_space<vmem>>, vector<1x256xf32>
    %13 = vector.broadcast %12 : vector<1x256xf32> to vector<8x256xf32>
    %14 = arith.addf %11, %13 : vector<8x256xf32>
    %cst_11 = arith.constant 0.000000e+00 : f32
    %15 = vector.broadcast %cst_11 : f32 to vector<8x256xf32>
    %16 = arith.maximumf %14, %15 : vector<8x256xf32>
    %17 = arith.truncf %16 : vector<8x256xf32> to vector<8x256xbf16>
    %c0_12 = arith.constant 0 : index
    %c0_13 = arith.constant 0 : index
    %18 = vector.load %arg6[%c0_12, %c0_13] : memref<256x256xbf16, #tpu.memory_space<vmem>>, vector<256x256xbf16>
    %cst_14 = arith.constant dense<0.000000e+00> : vector<8x256xf32>
    %19 = tpu.matmul %17, %18, %cst_14 {dimension_numbers = #tpu.dot_dimension_numbers<[1], [0], [0], [1], [0, 0, 1, 1], [], []>} : vector<8x256xbf16>, vector<256x256xbf16>, vector<8x256xf32> -> vector<8x256xf32>
    %c0_15 = arith.constant 0 : index
    %c0_16 = arith.constant 0 : index
    %20 = vector.load %arg7[%c0_15, %c0_16] : memref<1x256xf32, #tpu.memory_space<vmem>>, vector<1x256xf32>
    %21 = vector.broadcast %20 : vector<1x256xf32> to vector<8x256xf32>
    %22 = arith.addf %19, %21 : vector<8x256xf32>
    %23 = vector.extract_strided_slice %22 {offsets = [0, 0], sizes = [8, 128], strides = [1, 1]} : vector<8x256xf32> to vector<8x128xf32>
    %24 = vector.extract_strided_slice %22 {offsets = [0, 128], sizes = [8, 128], strides = [1, 1]} : vector<8x256xf32> to vector<8x128xf32>
    %25 = math.tanh %24 : vector<8x128xf32>
    %cst_17 = arith.constant 1.000000e+00 : f32
    %26 = vector.broadcast %cst_17 : f32 to vector<8x128xf32>
    %27 = arith.addf %25, %26 : vector<8x128xf32>
    %cst_18 = arith.constant 3.500000e+00 : f32
    %28 = vector.broadcast %cst_18 : f32 to vector<8x128xf32>
    %29 = arith.mulf %28, %27 : vector<8x128xf32>
    %cst_19 = arith.constant -5.000000e+00 : f32
    %30 = vector.broadcast %cst_19 : f32 to vector<8x128xf32>
    %31 = arith.addf %30, %29 : vector<8x128xf32>
    %c0_20 = arith.constant 0 : index
    %c0_21 = arith.constant 0 : index
    %32 = vector.load %arg8[%c0_20, %c0_21] : memref<8x256xf32, #tpu.memory_space<vmem>>, vector<8x128xf32>
    tpu.vector_store %arg8[%c0_20, %c0_21], %23 {strides = array<i32>} : memref<8x256xf32, #tpu.memory_space<vmem>>, vector<8x128xf32>,
    %c0_22 = arith.constant 0 : index
    %c128 = arith.constant 128 : index
    %33 = vector.load %arg8[%c0_22, %c128] : memref<8x256xf32, #tpu.memory_space<vmem>>, vector<8x128xf32>
    tpu.vector_store %arg8[%c0_22, %c128], %31 {strides = array<i32>} : memref<8x256xf32, #tpu.memory_space<vmem>>, vector<8x128xf32>,
    return
  }
  func.func @transform_0(%arg0: i32) -> (i32, i32) {
    %c0_i32 = arith.constant 0 : i32
    %c0_i32_0 = arith.constant 0 : i32
    return %arg0, %c0_i32 : i32, i32
  }
  func.func @transform_1(%arg0: i32) -> (i32, i32) {
    %c0_i32 = arith.constant 0 : i32
    %c0_i32_0 = arith.constant 0 : i32
    %c0_i32_1 = arith.constant 0 : i32
    return %c0_i32, %c0_i32_0 : i32, i32
  }
  func.func @transform_2(%arg0: i32) -> (i32, i32) {
    %c0_i32 = arith.constant 0 : i32
    %c0_i32_0 = arith.constant 0 : i32
    %c0_i32_1 = arith.constant 0 : i32
    return %c0_i32, %c0_i32_0 : i32, i32
  }
  func.func @transform_3(%arg0: i32) -> (i32, i32) {
    %c0_i32 = arith.constant 0 : i32
    %c0_i32_0 = arith.constant 0 : i32
    %c0_i32_1 = arith.constant 0 : i32
    return %c0_i32, %c0_i32_0 : i32, i32
  }
  func.func @transform_4(%arg0: i32) -> (i32, i32) {
    %c0_i32 = arith.constant 0 : i32
    %c0_i32_0 = arith.constant 0 : i32
    %c0_i32_1 = arith.constant 0 : i32
    return %c0_i32, %c0_i32_0 : i32, i32
  }
  func.func @transform_5(%arg0: i32) -> (i32, i32) {
    %c0_i32 = arith.constant 0 : i32
    %c0_i32_0 = arith.constant 0 : i32
    %c0_i32_1 = arith.constant 0 : i32
    return %c0_i32, %c0_i32_0 : i32, i32
  }
  func.func @transform_6(%arg0: i32) -> (i32, i32) {
    %c0_i32 = arith.constant 0 : i32
    %c0_i32_0 = arith.constant 0 : i32
    %c0_i32_1 = arith.constant 0 : i32
    return %c0_i32, %c0_i32_0 : i32, i32
  }
  func.func @transform_7(%arg0: i32) -> (i32, i32) {
    %c0_i32 = arith.constant 0 : i32
    %c0_i32_0 = arith.constant 0 : i32
    return %arg0, %c0_i32 : i32, i32
  }
}

</mosaic_0001>

<bundles_post_ra>
// kernel: actor_forward.1
= control target key start
LH: loop header
LB: loop body
LE: loop exit
PB: predicated region body
PF: predicated region fallthrough
CT: control target
= control target key end

     0   :  { %12 = vsyncpa [#allocation3], 0  ;;  %s1074_s0 = inlined_call_operand.vmem [shape: f32[8,128], index: 0, kind: input, shape index: {}]   ;;  %s1075_s1 = inlined_call_operand.hbm [shape: bf16[128,256], index: 1, kind: input, shape index: {}]   ;;  %s1076_s2 = inlined_call_operand.vmem [shape: f32[1,256], index: 2, kind: input, shape index: {}]   ;;  %s1077_s3 = inlined_call_operand.hbm [shape: bf16[256,256], index: 3, kind: input, shape index: {}]   ;;  %s1078_s4 = inlined_call_operand.vmem [shape: f32[1,256], index: 4, kind: input, shape index: {}]   ;;  %s1079_s5 = inlined_call_operand.hbm [shape: bf16[256,256], index: 5, kind: input, shape index: {}]   ;;  %s1080_s6 = inlined_call_operand.vmem [shape: f32[1,256], index: 6, kind: input, shape index: {}]   ;;  %s1081_s7 = inlined_call_operand.vmem [shape: f32[8,256], index: 7, kind: output, shape index: {}]  }
   0x1   :  { %13 = vsyncpa [#allocation5], 0  ;;  %s1001_s24 = smov [#allocation4]   ;;  %s1002_s26 = smov [#allocation2]  }
   0x2   :  { %s35_s25 = sshll.u32 %s1001_s24, 4  ;;  %s21_s27 = sshll.u32 %s1002_s26, 4  ;;  %s36_s25 = int_to_ptr.vmem [resolvable:$true] %s35_s25  ;;  %s22_s27 = int_to_ptr.vmem [resolvable:$true] %s21_s27 }
   0x3   :  { %s945_s28 = scalar_lea.vmem %s36_s25, 4096  ;;  %p950_p1 = scmp.lt.s32.totalorder %s36_s25, %s36_s25 }
   0x4   :  { %p946_p0 = scmp.ne.s32.totalorder %s36_s25, %s945_s28  ;;  %p951_p2 = scmp.lt.s32.totalorder %s945_s28, %s945_s28 }
   0x6   :  { %p952_p3 = por %p951_p2, %p950_p1 }
   0x8   :  { %p953_p4 = pnand %p952_p3, %p946_p0 }
   0xa   :  { %956 = shalt.err (!%p953_p4)
}
   0xb   :  { %s1003_s29 = smov 128   ;;  %s1004_s30 = smov 8  }
   0xc   :  { %41 = dma.hbm_to_vmem [thread:$0]  %s1077_s3, 4096, %s36_s25, [#allocation5], %s1003_s29, %s1003_s29, %s1004_s30  }
   0xd   :  { %s965_s10 = scalar_lea.vmem %s22_s27, 2048  ;;  %p970_p6 = scmp.lt.s32.totalorder %s22_s27, %s22_s27 }
   0xe   :  { %p966_p5 = scmp.ne.s32.totalorder %s22_s27, %s965_s10  ;;  %p971_p7 = scmp.lt.s32.totalorder %s965_s10, %s965_s10 }
  0x10   :  { %p972_p8 = por %p971_p7, %p970_p6 }
  0x12   :  { %p973_p9 = pnand %p972_p8, %p966_p5 }
  0x14   :  { %976 = shalt.err (!%p973_p9)
}
  0x15   :  { %27 = dma.hbm_to_vmem [thread:$0]  %s1075_s1, 2048, %s22_s27, [#allocation3], %s1003_s29, %s1003_s29, %s1004_s30  }
  0x16   :  { %s1005_s13 = smov [#allocation6]  }
  0x17   :  { %s49_s14 = sshll.u32 %s1005_s13, 4  ;;  %s50_s14 = int_to_ptr.vmem [resolvable:$true] %s49_s14 }
  0x18   :  { %s985_s15 = scalar_lea.vmem %s50_s14, 4096  ;;  %p990_p11 = scmp.lt.s32.totalorder %s50_s14, %s50_s14 }
  0x19   :  { %p986_p10 = scmp.ne.s32.totalorder %s50_s14, %s985_s15  ;;  %p991_p12 = scmp.lt.s32.totalorder %s985_s15, %s985_s15 }
  0x1b   :  { %p992_p13 = por %p991_p12, %p990_p11 }
  0x1d   :  { %p993_p0 = pnand %p992_p13, %p986_p10 }
  0x1f   :  { %996 = shalt.err (!%p993_p0)
}
  0x20   :  { %55 = dma.hbm_to_vmem [thread:$0]  %s1079_s5, 4096, %s50_s14, [#allocation5], %s1003_s29, %s1003_s29, %s1004_s30  }
  0x21   :  { %997 = dma.done.wait [#allocation3], 2048  }
  0x22   :  { %998 = vsyncadd [#allocation3], 4294965248 }
  0x23   :  { %999 = dma.done.wait [#allocation5], 8192  }
  0x24   :  { %1000 = vsyncadd [#allocation5], 4294959104  ;;  %v1006_v0 = vmov 0   ;;  %v815_v1 = vld [vmem:[#allocation2 + $0x74] ss:$8 sps:$4 sm:$0xff]   ;;  %v68_v26 = vld [vmem:[%s1074_s0] sm:$0xff] }
  0x25   :  { %210 = vmatprep.mubr.bf16.mxu0 %v1006_v0  ;;  %v817_v2 = vld [vmem:[#allocation2 + $0x70] ss:$8 sps:$4 sm:$0xff]   ;;  %178 = vmatprep.subr.bf16.mxu0 %v815_v1  ;;  %v818_v3 = vld [vmem:[#allocation2 + $0x64] ss:$8 sps:$4 sm:$0xff]   ;;  %v820_v4 = vld [vmem:[#allocation2 + $0x60] ss:$8 sps:$4 sm:$0xff]   ;;  %v69_v31 = vpack.c.bf16 %v68_v26, %v68_v26 }
  0x26   :  { %179 = vmatpush1.bf16.msra.mxu0 %v817_v2  ;;  %v821_v5 = vld [vmem:[#allocation2 + $0x54] ss:$8 sps:$4 sm:$0xff]   ;;  %v823_v6 = vld [vmem:[#allocation2 + $0x50] ss:$8 sps:$4 sm:$0xff]   ;;  %v824_v7 = vld [vmem:[#allocation2 + $0x44] ss:$8 sps:$4 sm:$0xff]  }
  0x27   :  { %180 = vmatprep.subr.bf16.mxu0 %v818_v3  ;;  %v826_v8 = vld [vmem:[#allocation2 + $0x40] ss:$8 sps:$4 sm:$0xff]   ;;  %v827_v9 = vld [vmem:[#allocation2 + $0x34] ss:$8 sps:$4 sm:$0xff]   ;;  %v841_v11 = vld [vmem:[#allocation4 + $0x70] ss:$8 sps:$4 sm:$0xff]  }
  0x28   :  { %v839_v10 = vld [vmem:[#allocation4 + $0x74] ss:$8 sps:$4 sm:$0xff]   ;;  %v842_v12 = vld [vmem:[#allocation4 + $0x64] ss:$8 sps:$4 sm:$0xff]   ;;  %v829_v13 = vld [vmem:[#allocation2 + $0x30] ss:$8 sps:$4 sm:$0xff]  }
  0x29   :  { %427 = vmatprep.subr.bf16.mxu1 %v839_v10  ;;  %v844_v14 = vld [vmem:[#allocation4 + $0x60] ss:$8 sps:$4 sm:$0xff]   ;;  %v845_v15 = vld [vmem:[#allocation4 + $0x54] ss:$8 sps:$4 sm:$0xff]   ;;  %v830_v16 = vld [vmem:[#allocation2 + $0x24] ss:$8 sps:$4 sm:$0xff]  }
  0x2a   :  { %181 = vmatpush1.bf16.msra.mxu0 %v820_v4  ;;  %428 = vmatpush1.bf16.msra.mxu1 %v841_v11  ;;  %v832_v17 = vld [vmem:[#allocation2 + $0x20] ss:$8 sps:$4 sm:$0xff]   ;;  %v847_v18 = vld [vmem:[#allocation4 + $0x50] ss:$8 sps:$4 sm:$0xff]   ;;  %v848_v19 = vld [vmem:[#allocation4 + $0x44] ss:$8 sps:$4 sm:$0xff]  }
  0x2b   :  { %182 = vmatprep.subr.bf16.mxu0 %v821_v5  ;;  %429 = vmatprep.subr.bf16.mxu1 %v842_v12  ;;  %v833_v20 = vld [vmem:[#allocation2 + $0x14] ss:$8 sps:$4 sm:$0xff]   ;;  %v835_v21 = vld [vmem:[#allocation2 + $0x10] ss:$8 sps:$4 sm:$0xff]   ;;  %v850_v22 = vld [vmem:[#allocation4 + $0x40] ss:$8 sps:$4 sm:$0xff]  }
  0x2c   :  { %v851_v23 = vld [vmem:[#allocation4 + $0x34] ss:$8 sps:$4 sm:$0xff]   ;;  %v836_v24 = vld [vmem:[#allocation2 + $0x4] ss:$8 sps:$4 sm:$0xff]   ;;  %v838_v25 = vld [vmem:[#allocation2] ss:$8 sps:$4 sm:$0xff]  }
  0x2d   :  { %v853_v27 = vld [vmem:[#allocation4 + $0x30] ss:$8 sps:$4 sm:$0xff]   ;;  %v854_v28 = vld [vmem:[#allocation4 + $0x24] ss:$8 sps:$4 sm:$0xff]   ;;  %v856_v29 = vld [vmem:[#allocation4 + $0x20] ss:$8 sps:$4 sm:$0xff]  }
  0x2e   :  { %183 = vmatpush1.bf16.msra.mxu0 %v823_v6  ;;  %430 = vmatpush1.bf16.msra.mxu1 %v844_v14  ;;  %v857_v30 = vld [vmem:[#allocation4 + $0x14] ss:$8 sps:$4 sm:$0xff]   ;;  %v859_v32 = vld [vmem:[#allocation4 + $0x10] ss:$8 sps:$4 sm:$0xff]   ;;  %v860_v33 = vld [vmem:[#allocation4 + $0x4] ss:$8 sps:$4 sm:$0xff]  }
  0x2f   :  { %184 = vmatprep.subr.bf16.mxu0 %v824_v7  ;;  %431 = vmatprep.subr.bf16.mxu1 %v845_v15  ;;  %v862_v34 = vld [vmem:[#allocation4] ss:$8 sps:$4 sm:$0xff]   ;;  %v863_v35 = vld [vmem:[#allocation4 + $0xf4] ss:$8 sps:$4 sm:$0xff]   ;;  %v865_v36 = vld [vmem:[#allocation4 + $0xf0] ss:$8 sps:$4 sm:$0xff]   ;;  %v88_v15 = vlaneseq }
  0x30   :  { %v866_v37 = vld [vmem:[#allocation4 + $0xe4] ss:$8 sps:$4 sm:$0xff]   ;;  %v868_v38 = vld [vmem:[#allocation4 + $0xe0] ss:$8 sps:$4 sm:$0xff]   ;;  %v869_v39 = vld [vmem:[#allocation4 + $0xd4] ss:$8 sps:$4 sm:$0xff]  }
  0x31   :  { %v871_v40 = vld [vmem:[#allocation4 + $0xd0] ss:$8 sps:$4 sm:$0xff]   ;;  %v872_v41 = vld [vmem:[#allocation4 + $0xc4] ss:$8 sps:$4 sm:$0xff]   ;;  %v874_v42 = vld [vmem:[#allocation4 + $0xc0] ss:$8 sps:$4 sm:$0xff]  }
  0x32   :  { %185 = vmatpush1.bf16.msra.mxu0 %v826_v8  ;;  %432 = vmatpush1.bf16.msra.mxu1 %v847_v18  ;;  %v875_v43 = vld [vmem:[#allocation4 + $0xb4] ss:$8 sps:$4 sm:$0xff]   ;;  %v877_v44 = vld [vmem:[#allocation4 + $0xb0] ss:$8 sps:$4 sm:$0xff]   ;;  %v878_v45 = vld [vmem:[#allocation4 + $0xa4] ss:$8 sps:$4 sm:$0xff]  }
  0x33   :  { %186 = vmatprep.subr.bf16.mxu0 %v827_v9  ;;  %433 = vmatprep.subr.bf16.mxu1 %v848_v19  ;;  %v880_v46 = vld [vmem:[#allocation4 + $0xa0] ss:$8 sps:$4 sm:$0xff]   ;;  %v881_v47 = vld [vmem:[#allocation4 + $0x94] ss:$8 sps:$4 sm:$0xff]   ;;  %v883_v48 = vld [vmem:[#allocation4 + $0x90] ss:$8 sps:$4 sm:$0xff]  }
  0x34   :  { %v884_v49 = vld [vmem:[#allocation4 + $0x84] ss:$8 sps:$4 sm:$0xff]   ;;  %v886_v50 = vld [vmem:[#allocation4 + $0x80] ss:$8 sps:$4 sm:$0xff]   ;;  %v887_v51 = vld [vmem:[#allocation6 + $0x70] ss:$8 sps:$4 sm:$0xff]  }
  0x35   :  { %v889_v52 = vld [vmem:[#allocation6 + $0x74] ss:$8 sps:$4 sm:$0xff]   ;;  %v892_v53 = vld [vmem:[#allocation6 + $0x64] ss:$8 sps:$4 sm:$0xff]   ;;  %v890_v54 = vld [vmem:[#allocation6 + $0x60] ss:$8 sps:$4 sm:$0xff]  }
  0x36   :  { %187 = vmatpush1.bf16.msra.mxu0 %v829_v13  ;;  %434 = vmatpush1.bf16.msra.mxu1 %v850_v22  ;;  %v895_v55 = vld [vmem:[#allocation6 + $0x54] ss:$8 sps:$4 sm:$0xff]   ;;  %v893_v56 = vld [vmem:[#allocation6 + $0x50] ss:$8 sps:$4 sm:$0xff]   ;;  %v898_v57 = vld [vmem:[#allocation6 + $0x44] ss:$8 sps:$4 sm:$0xff]  }
  0x37   :  { %188 = vmatprep.subr.bf16.mxu0 %v830_v16  ;;  %435 = vmatprep.subr.bf16.mxu1 %v851_v23  ;;  %v896_v58 = vld [vmem:[#allocation6 + $0x40] ss:$8 sps:$4 sm:$0xff]   ;;  %v901_v59 = vld [vmem:[#allocation6 + $0x34] ss:$8 sps:$4 sm:$0xff]   ;;  %v899_v60 = vld [vmem:[#allocation6 + $0x30] ss:$8 sps:$4 sm:$0xff]  }
  0x38   :  { %v904_v61 = vld [vmem:[#allocation6 + $0x24] ss:$8 sps:$4 sm:$0xff]   ;;  %v902_v62 = vld [vmem:[#allocation6 + $0x20] ss:$8 sps:$4 sm:$0xff]   ;;  %v907_v63 = vld [vmem:[#allocation6 + $0x14] ss:$8 sps:$4 sm:$0xff]  }
  0x39   :  { %v905_v0 = vld [vmem:[#allocation6 + $0x10] ss:$8 sps:$4 sm:$0xff]   ;;  %v910_v1 = vld [vmem:[#allocation6 + $0x4] ss:$8 sps:$4 sm:$0xff]   ;;  %v908_v2 = vld [vmem:[#allocation6] ss:$8 sps:$4 sm:$0xff]  }
  0x3a   :  { %189 = vmatpush1.bf16.msra.mxu0 %v832_v17  ;;  %436 = vmatpush1.bf16.msra.mxu1 %v853_v27  ;;  %v913_v3 = vld [vmem:[#allocation6 + $0xf4] ss:$8 sps:$4 sm:$0xff]   ;;  %v911_v4 = vld [vmem:[#allocation6 + $0xf0] ss:$8 sps:$4 sm:$0xff]   ;;  %v916_v5 = vld [vmem:[#allocation6 + $0xe4] ss:$8 sps:$4 sm:$0xff]  }
  0x3b   :  { %190 = vmatprep.subr.bf16.mxu0 %v833_v20  ;;  %437 = vmatprep.subr.bf16.mxu1 %v854_v28  ;;  %v914_v6 = vld [vmem:[#allocation6 + $0xe0] ss:$8 sps:$4 sm:$0xff]   ;;  %v919_v7 = vld [vmem:[#allocation6 + $0xd4] ss:$8 sps:$4 sm:$0xff]   ;;  %v917_v8 = vld [vmem:[#allocation6 + $0xd0] ss:$8 sps:$4 sm:$0xff]  }
  0x3c   :  { %v922_v9 = vld [vmem:[#allocation6 + $0xc4] ss:$8 sps:$4 sm:$0xff]   ;;  %v920_v10 = vld [vmem:[#allocation6 + $0xc0] ss:$8 sps:$4 sm:$0xff]   ;;  %v925_v11 = vld [vmem:[#allocation6 + $0xb4] ss:$8 sps:$4 sm:$0xff]  }
  0x3d   :  { %v923_v12 = vld [vmem:[#allocation6 + $0xb0] ss:$8 sps:$4 sm:$0xff]   ;;  %v928_v13 = vld [vmem:[#allocation6 + $0xa4] ss:$8 sps:$4 sm:$0xff]   ;;  %v926_v14 = vld [vmem:[#allocation6 + $0xa0] ss:$8 sps:$4 sm:$0xff]  }
  0x3e   :  { %191 = vmatpush1.bf16.msra.mxu0 %v835_v21  ;;  %438 = vmatpush1.bf16.msra.mxu1 %v856_v29  ;;  %v89_v16 = vshrl.u32 %v88_v15, 7  ;;  %v86_v18 = vld [vmem:[%s1076_s2] sm:$0x3] }
  0x3f   :  { %192 = vmatprep.subr.bf16.mxu0 %v836_v24  ;;  %439 = vmatprep.subr.bf16.mxu1 %v857_v30 }
  0x40   :  { %v90_v17 = vsub.s32 0, %v89_v16  ;;  %v94_v19 = vsub.s32 1, %v89_v16 }
  0x42   :  { %193 = vmatpush1.bf16.msra.mxu0 %v838_v25  ;;  %440 = vmatpush1.bf16.msra.mxu1 %v859_v32  ;;  %v91_v20 = vrot.slane %v86_v18, %v90_v17  ;;  %v95_v21 = vrot.slane %v86_v18, %v94_v19  ;;  %v931_v32 = vld [vmem:[#allocation6 + $0x94] ss:$8 sps:$4 sm:$0xff]  }
  0x43   :  { %441 = vmatprep.subr.bf16.mxu1 %v860_v33  ;;  %676 = vmatprep.subr.bf16.mxu0 %v889_v52  ;;  %v929_v33 = vld [vmem:[#allocation6 + $0x90] ss:$8 sps:$4 sm:$0xff]  }
  0x45   :  { %211 = vmatmul.mubr.bf16.vlgmr.msra.gmra.mxu0 %v69_v31 }
  0x46   :  { %442 = vmatpush1.bf16.msra.mxu1 %v862_v34  ;;  %677 = vmatpush1.bf16.msra.mxu0 %v887_v51  ;;  %v934_v34 = vld [vmem:[#allocation6 + $0x84] ss:$8 sps:$4 sm:$0xff]  }
  0x47   :  { %443 = vmatprep.subr.bf16.mxu1 %v863_v35  ;;  %678 = vmatprep.subr.bf16.mxu0 %v892_v53  ;;  %v932_v35 = vld [vmem:[#allocation6 + $0x80] ss:$8 sps:$4 sm:$0xff]  }
  0x4a   :  { %444 = vmatpush2.bf16.msra.mxu1 %v865_v36  ;;  %679 = vmatpush1.bf16.msra.mxu0 %v890_v54  ;;  %v255_v36 = vld [vmem:[%s1078_s4] sm:$0x3] }
  0x4b   :  { %445 = vmatprep.subr.bf16.mxu1 %v866_v37  ;;  %680 = vmatprep.subr.bf16.mxu0 %v895_v55  ;;  %v260_v37 = vrot.slane %v255_v36, %v90_v17 }
  0x4e   :  { %446 = vmatpush2.bf16.msra.mxu1 %v868_v38  ;;  %681 = vmatpush1.bf16.msra.mxu0 %v893_v56  ;;  %v264_v38 = vrot.slane %v255_v36, %v94_v19 }
  0x4f   :  { %447 = vmatprep.subr.bf16.mxu1 %v869_v39  ;;  %682 = vmatprep.subr.bf16.mxu0 %v898_v57 }
  0x52   :  { %448 = vmatpush2.bf16.msra.mxu1 %v871_v40  ;;  %683 = vmatpush1.bf16.msra.mxu0 %v896_v58 }
  0x53   :  { %449 = vmatprep.subr.bf16.mxu1 %v872_v41  ;;  %684 = vmatprep.subr.bf16.mxu0 %v901_v59 }
  0x56   :  { %450 = vmatpush2.bf16.msra.mxu1 %v874_v42  ;;  %685 = vmatpush1.bf16.msra.mxu0 %v899_v60 }
  0x57   :  { %451 = vmatprep.subr.bf16.mxu1 %v875_v43  ;;  %686 = vmatprep.subr.bf16.mxu0 %v904_v61 }
  0x5a   :  { %452 = vmatpush2.bf16.msra.mxu1 %v877_v44  ;;  %687 = vmatpush1.bf16.msra.mxu0 %v902_v62 }
  0x5b   :  { %453 = vmatprep.subr.bf16.mxu1 %v878_v45  ;;  %688 = vmatprep.subr.bf16.mxu0 %v907_v63 }
  0x5e   :  { %454 = vmatpush2.bf16.msra.mxu1 %v880_v46  ;;  %689 = vmatpush1.bf16.msra.mxu0 %v905_v0 }
  0x5f   :  { %455 = vmatprep.subr.bf16.mxu1 %v881_v47  ;;  %690 = vmatprep.subr.bf16.mxu0 %v910_v1 }
  0x62   :  { %456 = vmatpush2.bf16.msra.mxu1 %v883_v48  ;;  %691 = vmatpush1.bf16.msra.mxu0 %v908_v2 }
  0x63   :  { %457 = vmatprep.subr.bf16.mxu1 %v884_v49  ;;  %692 = vmatprep.subr.bf16.mxu0 %v913_v3  ;;  %v504_v49 = vld [vmem:[%s1080_s6] sm:$0x3] }
  0x64   :  { %v513_v51 = vrot.slane %v504_v49, %v94_v19 }
  0x66   :  { %458 = vmatpush2.bf16.msra.mxu1 %v886_v50  ;;  %693 = vmatpush2.bf16.msra.mxu0 %v911_v4  ;;  %v509_v50 = vrot.slane %v504_v49, %v90_v17 }
  0x67   :  { %694 = vmatprep.subr.bf16.mxu0 %v916_v5 }
  0x6a   :  { %695 = vmatpush2.bf16.msra.mxu0 %v914_v6 }
  0x6b   :  { %696 = vmatprep.subr.bf16.mxu0 %v919_v7 }
  0x6e   :  { %697 = vmatpush2.bf16.msra.mxu0 %v917_v8 }
  0x6f   :  { %698 = vmatprep.subr.bf16.mxu0 %v922_v9 }
  0x72   :  { %699 = vmatpush2.bf16.msra.mxu0 %v920_v10 }
  0x73   :  { %700 = vmatprep.subr.bf16.mxu0 %v925_v11 }
  0x76   :  { %701 = vmatpush2.bf16.msra.mxu0 %v923_v12 }
  0x77   :  { %702 = vmatprep.subr.bf16.mxu0 %v928_v13 }
  0x7a   :  { %703 = vmatpush2.bf16.msra.mxu0 %v926_v14 }
  0x7b   :  { %704 = vmatprep.subr.bf16.mxu0 %v931_v32 }
  0x7e   :  { %705 = vmatpush2.bf16.msra.mxu0 %v929_v33 }
  0x7f   :  { %706 = vmatprep.subr.bf16.mxu0 %v934_v34 }
  0x82   :  { %707 = vmatpush2.bf16.msra.mxu0 %v932_v35 }
 0x105   :  { %v212_v22 = vpop.f32.mrf.mxu0 }
 0x106   :  { %v213_v23 = vadd.f32 %v212_v22, %v91_v20 }
 0x107   :  { %v214_v24 = vpop.f32.mrf.mxu0 }
 0x108   :  { %v215_v25 = vadd.f32 %v214_v24, %v95_v21  ;;  %v219_v26 = vmax.f32 %v213_v23, 0.0 }
 0x109   :  { %v216_v27 = vpop.f32.mrf.mxu0 }
 0x10a   :  { %v220_v28 = vmax.f32 %v215_v25, 0.0  ;;  %v221_v31 = vpack.c.bf16 %v219_v26, %v219_v26 }
 0x10b   :  { %v217_v29 = vpop.f32.mrf.mxu0 }
 0x10c   :  { %v222_v30 = vpack.c.bf16 %v220_v28, %v220_v28 }
 0x10e   :  { %459 = vmatprep.mubr.bf16.mxu1 %v222_v30 }
 0x10f   :  { %460 = vmatmul.mubr.bf16.vlgmr.msra.gmra.mxu1 %v221_v31 }
 0x1cf   :  { %v461_v39 = vpop.f32.mrf.mxu1 }
 0x1d0   :  { %v462_v40 = vadd.f32 %v461_v39, %v260_v37 }
 0x1d1   :  { %v463_v41 = vpop.f32.mrf.mxu1 }
 0x1d2   :  { %v464_v42 = vadd.f32 %v463_v41, %v264_v38  ;;  %v468_v43 = vmax.f32 %v462_v40, 0.0 }
 0x1d3   :  { %v465_v44 = vpop.f32.mrf.mxu1 }
 0x1d4   :  { %v469_v45 = vmax.f32 %v464_v42, 0.0  ;;  %v470_v48 = vpack.c.bf16 %v468_v43, %v468_v43 }
 0x1d5   :  { %v466_v46 = vpop.f32.mrf.mxu1 }
 0x1d6   :  { %v471_v47 = vpack.c.bf16 %v469_v45, %v469_v45 }
 0x1d8   :  { %708 = vmatprep.mubr.bf16.mxu0 %v471_v47 }
 0x1d9   :  { %709 = vmatmul.mubr.bf16.vlgmr.msra.gmra.mxu0 %v470_v48 }
 0x299   :  { %v710_v52 = vpop.f32.mrf.mxu0 }
 0x29a   :  { %v711_v53 = vadd.f32 %v710_v52, %v509_v50 }
 0x29b   :  { %v712_v54 = vpop.f32.mrf.mxu0 }
 0x29c   :  { %721 = vst [vmem:[%s1081_s7] sm:$0xff] %v711_v53  ;;  %v713_v55 = vadd.f32 %v712_v54, %v513_v51 }
 0x29d   :  { %v714_v56 = vpop.f32.mrf.mxu0 }
 0x29e   :  { %935 = vtanh.f32 %v713_v55 }
 0x29f   :  { %v715_v57 = vpop.f32.mrf.mxu0 }
 0x2ab   :  { %v936_v58 = vpop.eup %935 }
 0x2ac   :  { %v718_v59 = vadd.f32 1.0, %v936_v58 }
 0x2ae   :  { %v719_v60 = vmul.f32 3.5, %v718_v59 }
 0x2b0   :  { %v720_v61 = vadd.f32 -5.0, %v719_v60 }
 0x2b2   :  { %722 = vst [vmem:[%s1081_s7 + $0x8] sm:$0xff] %v720_v61 }
 0x2b3   :  { %727 = vsyncpa [#allocation3], 1 }
 0x2b4   :  { %728 = vsyncpa [#allocation5], 1 }

</bundles_post_ra>
